<compile_context>
chip_gen: v5e
topology: v5e:2x2
jax: 0.10.0
libtpu: 0.0.40
codegen_flags: <defaults>
</compile_context>

<pallas_src>
import functools

import jax
import jax.numpy as jnp
from jax.experimental import pallas as pl
from jax.experimental.pallas import tpu as pltpu

T = 0.07
EPS = 1e-12
_LANE = 128
_MAX_TILE_HW = 1024                      # >=512 lanes is already ~85% of HBM roofline
_INPUT_VMEM_BUDGET = 8 * 1024 * 1024     # bytes for 4 inputs x 2 pipeline buffers


def _round_up(x, m):
    return (x + m - 1) // m * m


def _freq_nce_kernel(fb_ref, fd_ref, bf_ref, df_ref, out_ref, acc_ref):
    """Inputs: 4x (C, TILE_HW) native-dtype tiles.
    Output block: (4, 128) f32 partial logits (row k broadcast over lanes).
    Scratch: (4, TILE_HW) f32 accumulator of per-column normalized dots."""
    j = pl.program_id(1)

    @pl.when(j == 0)
    def _init():
        acc_ref[...] = jnp.zeros_like(acc_ref)

    # Cast after the (possibly sub-32-bit) VMEM load; accumulate in f32.
    fb = fb_ref[...].astype(jnp.float32)
    fd = fd_ref[...].astype(jnp.float32)
    bf = bf_ref[...].astype(jnp.float32)
    df = df_ref[...].astype(jnp.float32)

    def csum(x):
        # Per-spatial-column reduction over channels (cheap cross-sublane reduce).
        return jnp.sum(x, axis=0, keepdims=True)            # (1, TILE_HW)

    eps2 = jnp.float32(EPS * EPS)
    # 1 / max(||x||, eps) == rsqrt(max(||x||^2, eps^2))  -> EUP slot, not VPU.
    inv_fb = jax.lax.rsqrt(jnp.maximum(csum(fb * fb), eps2))
    inv_fd = jax.lax.rsqrt(jnp.maximum(csum(fd * fd), eps2))
    inv_bf = jax.lax.rsqrt(jnp.maximum(csum(bf * bf), eps2))
    inv_df = jax.lax.rsqrt(jnp.maximum(csum(df * df), eps2))

    # Raw channel dots; the normalized arrays are never materialized.
    # Zero-padded columns give dot == 0 and finite inv -> contribute exactly 0.
    ratios = jnp.concatenate(
        [csum(fd * df) * (inv_fd * inv_df),    # l_pos_d
         csum(fb * bf) * (inv_fb * inv_bf),    # l_pos_b
         csum(fd * bf) * (inv_fd * inv_bf),    # l_neg_d
         csum(fb * df) * (inv_fb * inv_df)],   # l_neg_b
        axis=0)                                 # (4, TILE_HW)
    acc_ref[...] += ratios

    @pl.when(j == pl.num_programs(1) - 1)
    def _finalize():
        # Single batched cross-lane reduction for all four logits of this slice.
        row_sums = jnp.sum(acc_ref[...], axis=-1, keepdims=True)   # (4, 1)
        out_ref[...] = jnp.broadcast_to(row_sums, out_ref.shape)   # (4, 128)


@jax.jit
def _freq_nce_forward(fuse_b, fuse_d, base_f, detail_f):
    assert fuse_b.shape[0] == 1, "reference .view(1, 1) implies batch == 1"
    c = fuse_b.shape[1]
    hw = 1
    for d in fuse_b.shape[2:]:
        hw *= d

    itemsize = jnp.dtype(fuse_b.dtype).itemsize
    # Tile the lane (flattened spatial) axis: 4 inputs x 2 pipeline buffers x
    # (C x TILE_HW x itemsize) <= budget; lanes a multiple of 128.
    max_tile = max(_LANE, (_INPUT_VMEM_BUDGET // (4 * 2 * c * itemsize)) // _LANE * _LANE)
    tile_hw = max(_LANE, min(_MAX_TILE_HW, _round_up(hw, _LANE), max_tile))
    n_tiles = pl.cdiv(hw, tile_hw)
    par = 2 if n_tiles >= 2 else 1          # 2-way split feeds both TCs on v7x
    n_inner = pl.cdiv(n_tiles, par)
    hw_pad = par * n_inner * tile_hw

    def prep(x):
        # Channels on sublanes (normalization axis), flattened spatial on lanes.
        x2 = x.reshape(c, hw)               # keep native dtype: no HBM upcast
        if hw_pad != hw:                    # zero columns contribute exactly 0
            x2 = jnp.pad(x2, ((0, 0), (0, hw_pad - hw)))
        return x2

    fb, fd, bf, df = prep(fuse_b), prep(fuse_d), prep(base_f), prep(detail_f)

    in_spec = pl.BlockSpec((c, tile_hw), lambda p, j: (0, p * n_inner + j))
    grid_spec = pltpu.PrefetchScalarGridSpec(
        num_scalar_prefetch=0,
        grid=(par, n_inner),
        in_specs=[in_spec] * 4,
        out_specs=pl.BlockSpec((pl.Squeezed(), 4, _LANE), lambda p, j: (p, 0, 0)),
        scratch_shapes=[pltpu.VMEM((4, tile_hw), jnp.float32)],
    )
    partials = pl.pallas_call(
        _freq_nce_kernel,
        out_shape=jax.ShapeDtypeStruct((par, 4, _LANE), jnp.float32),
        grid_spec=grid_spec,
        compiler_params=pltpu.CompilerParams(
            dimension_semantics=("parallel", "arbitrary"),
            vmem_limit_bytes=32 * 1024 * 1024,
        ),
    )(fb, fd, bf, df)

    # Combine per-core partials: [pos_d, pos_b, neg_d, neg_b] / T, identical to
    # the reference's scatter_add + cat + / T.
    out = (jnp.sum(partials[:, :, 0], axis=0) / T).reshape(4, 1)
    # CrossEntropyLoss(reduction='none') with target class 0 (single column);
    # kept generic (log-softmax) rather than hard-coding the resulting zeros.
    loss = -(out - jax.scipy.special.logsumexp(out, axis=1, keepdims=True))[:, 0]
    return loss, out


def freq_nce_loss(fuse_b, fuse_d, base_f, detail_f):
    loss, _ = _freq_nce_forward(fuse_b, fuse_d, base_f, detail_f)
    return loss


if __name__ == "__main__":
    key = jax.random.PRNGKey(0)
    k1, k2, k3, k4 = jax.random.split(key, 4)
    shape = (1, 4, 16, 16)  # (N=1, C, H, W): batch must be 1 per the reference
    fuse_b = jax.random.normal(k1, shape, dtype=jnp.float32)
    fuse_d = jax.random.normal(k2, shape, dtype=jnp.float32)
    base_f = jax.random.normal(k3, shape, dtype=jnp.float32)
    detail_f = jax.random.normal(k4, shape, dtype=jnp.float32)

    loss, out = _freq_nce_forward(fuse_b, fuse_d, base_f, detail_f)
    loss = jax.block_until_ready(loss)

    # Pure-JAX reference for the pre-CE logits and the loss.
    def _ref(a, b, cc, d):
        def nrm(x):
            n = jnp.sqrt(jnp.sum(x * x, axis=1, keepdims=True))
            return x / jnp.maximum(n, EPS)
        a, b, cc, d = nrm(a), nrm(b), nrm(cc), nrm(d)
        dot = lambda u, v: jnp.sum(u * v)
        o = jnp.stack([dot(b, d), dot(a, cc), dot(b, cc), dot(a, d)]) / T
        o = o.reshape(4, 1)
        l = -(o - jax.scipy.special.logsumexp(o, axis=1, keepdims=True))[:, 0]
        return l, o

    ref_loss, ref_out = _ref(fuse_b, fuse_d, base_f, detail_f)

    assert loss.shape == (4,) and loss.dtype == jnp.float32
    assert bool(jnp.allclose(out, ref_out, rtol=1e-4, atol=1e-3))
    # CrossEntropy over a single class column is exactly 0 for every row.
    assert bool(jnp.all(jnp.abs(loss - ref_loss) < 1e-5))
    print("KERNEL_OK")
</pallas_src>

<mosaic_0001>
module attributes {stable_mosaic.version = 11 : i64} {
  func.func @_freq_nce_kernel(%arg0: i32, %arg1: i32, %arg2: memref<4x256xf32, #tpu.memory_space<vmem>>, %arg3: memref<4x256xf32, #tpu.memory_space<vmem>>, %arg4: memref<4x256xf32, #tpu.memory_space<vmem>>, %arg5: memref<4x256xf32, #tpu.memory_space<vmem>>, %arg6: memref<1x4x128xf32, #tpu.memory_space<vmem>>, %arg7: memref<4x256xf32, #tpu.memory_space<vmem>>) attributes {dimension_semantics = [#tpu.dimension_semantics<parallel>, #tpu.dimension_semantics<arbitrary>], iteration_bounds = array<i64: 1, 1>, scalar_prefetch = 0 : i64, scratch_operands = 1 : i64, tpu.core_type = #tpu.core_type<tc>, window_params = [{transform_indices = @transform_0, window_bounds = array<i64: 4, 256>}, {transform_indices = @transform_1, window_bounds = array<i64: 4, 256>}, {transform_indices = @transform_2, window_bounds = array<i64: 4, 256>}, {transform_indices = @transform_3, window_bounds = array<i64: 4, 256>}, {transform_indices = @transform_4, window_bounds = array<i64: 1, 4, 128>}]} {
    %c0_i32 = arith.constant 0 : i32
    %0 = arith.cmpi eq, %arg1, %c0_i32 : i32
    %1 = arith.extui %0 : i1 to i32
    %c0_i32_0 = arith.constant 0 : i32
    %2 = arith.cmpi ne, %1, %c0_i32_0 : i32
    scf.if %2 {
      %cst_25 = arith.constant 0.000000e+00 : f32
      %58 = vector.broadcast %cst_25 : f32 to vector<4x256xf32>
      %c0_26 = arith.constant 0 : index
      %c0_27 = arith.constant 0 : index
      %59 = vector.load %arg7[%c0_26, %c0_27] : memref<4x256xf32, #tpu.memory_space<vmem>>, vector<4x256xf32>
      tpu.vector_store %arg7[%c0_26, %c0_27], %58 {strides = array<i32>} : memref<4x256xf32, #tpu.memory_space<vmem>>, vector<4x256xf32>,
    } else {
    }
    %c0 = arith.constant 0 : index
    %c0_1 = arith.constant 0 : index
    %3 = vector.load %arg2[%c0, %c0_1] : memref<4x256xf32, #tpu.memory_space<vmem>>, vector<4x256xf32>
    %c0_2 = arith.constant 0 : index
    %c0_3 = arith.constant 0 : index
    %4 = vector.load %arg3[%c0_2, %c0_3] : memref<4x256xf32, #tpu.memory_space<vmem>>, vector<4x256xf32>
    %c0_4 = arith.constant 0 : index
    %c0_5 = arith.constant 0 : index
    %5 = vector.load %arg4[%c0_4, %c0_5] : memref<4x256xf32, #tpu.memory_space<vmem>>, vector<4x256xf32>
    %c0_6 = arith.constant 0 : index
    %c0_7 = arith.constant 0 : index
    %6 = vector.load %arg5[%c0_6, %c0_7] : memref<4x256xf32, #tpu.memory_space<vmem>>, vector<4x256xf32>
    %7 = arith.mulf %3, %3 : vector<4x256xf32>
    %cst = arith.constant dense<0.000000e+00> : vector<256xf32>
    %8 = vector.multi_reduction <add>, %7, %cst [0] : vector<4x256xf32> to vector<256xf32>
    %9 = vector.shape_cast %8 : vector<256xf32> to vector<1x256xf32>
    %cst_8 = arith.constant 1.000000e-24 : f32
    %10 = vector.broadcast %cst_8 : f32 to vector<1x256xf32>
    %11 = arith.maximumf %9, %10 : vector<1x256xf32>
    %12 = math.rsqrt %11 : vector<1x256xf32>
    %13 = arith.mulf %4, %4 : vector<4x256xf32>
    %cst_9 = arith.constant dense<0.000000e+00> : vector<256xf32>
    %14 = vector.multi_reduction <add>, %13, %cst_9 [0] : vector<4x256xf32> to vector<256xf32>
    %15 = vector.shape_cast %14 : vector<256xf32> to vector<1x256xf32>
    %cst_10 = arith.constant 1.000000e-24 : f32
    %16 = vector.broadcast %cst_10 : f32 to vector<1x256xf32>
    %17 = arith.maximumf %15, %16 : vector<1x256xf32>
    %18 = math.rsqrt %17 : vector<1x256xf32>
    %19 = arith.mulf %5, %5 : vector<4x256xf32>
    %cst_11 = arith.constant dense<0.000000e+00> : vector<256xf32>
    %20 = vector.multi_reduction <add>, %19, %cst_11 [0] : vector<4x256xf32> to vector<256xf32>
    %21 = vector.shape_cast %20 : vector<256xf32> to vector<1x256xf32>
    %cst_12 = arith.constant 1.000000e-24 : f32
    %22 = vector.broadcast %cst_12 : f32 to vector<1x256xf32>
    %23 = arith.maximumf %21, %22 : vector<1x256xf32>
    %24 = math.rsqrt %23 : vector<1x256xf32>
    %25 = arith.mulf %6, %6 : vector<4x256xf32>
    %cst_13 = arith.constant dense<0.000000e+00> : vector<256xf32>
    %26 = vector.multi_reduction <add>, %25, %cst_13 [0] : vector<4x256xf32> to vector<256xf32>
    %27 = vector.shape_cast %26 : vector<256xf32> to vector<1x256xf32>
    %cst_14 = arith.constant 1.000000e-24 : f32
    %28 = vector.broadcast %cst_14 : f32 to vector<1x256xf32>
    %29 = arith.maximumf %27, %28 : vector<1x256xf32>
    %30 = math.rsqrt %29 : vector<1x256xf32>
    %31 = arith.mulf %4, %6 : vector<4x256xf32>
    %cst_15 = arith.constant dense<0.000000e+00> : vector<256xf32>
    %32 = vector.multi_reduction <add>, %31, %cst_15 [0] : vector<4x256xf32> to vector<256xf32>
    %33 = vector.shape_cast %32 : vector<256xf32> to vector<1x256xf32>
    %34 = arith.mulf %18, %30 : vector<1x256xf32>
    %35 = arith.mulf %33, %34 : vector<1x256xf32>
    %36 = arith.mulf %3, %5 : vector<4x256xf32>
    %cst_16 = arith.constant dense<0.000000e+00> : vector<256xf32>
    %37 = vector.multi_reduction <add>, %36, %cst_16 [0] : vector<4x256xf32> to vector<256xf32>
    %38 = vector.shape_cast %37 : vector<256xf32> to vector<1x256xf32>
    %39 = arith.mulf %12, %24 : vector<1x256xf32>
    %40 = arith.mulf %38, %39 : vector<1x256xf32>
    %41 = arith.mulf %4, %5 : vector<4x256xf32>
    %cst_17 = arith.constant dense<0.000000e+00> : vector<256xf32>
    %42 = vector.multi_reduction <add>, %41, %cst_17 [0] : vector<4x256xf32> to vector<256xf32>
    %43 = vector.shape_cast %42 : vector<256xf32> to vector<1x256xf32>
    %44 = arith.mulf %18, %24 : vector<1x256xf32>
    %45 = arith.mulf %43, %44 : vector<1x256xf32>
    %46 = arith.mulf %3, %6 : vector<4x256xf32>
    %cst_18 = arith.constant dense<0.000000e+00> : vector<256xf32>
    %47 = vector.multi_reduction <add>, %46, %cst_18 [0] : vector<4x256xf32> to vector<256xf32>
    %48 = vector.shape_cast %47 : vector<256xf32> to vector<1x256xf32>
    %49 = arith.mulf %12, %30 : vector<1x256xf32>
    %50 = arith.mulf %48, %49 : vector<1x256xf32>
    %51 = tpu.concatenate %35, %40, %45, %50 in 0 : vector<1x256xf32>, vector<1x256xf32>, vector<1x256xf32>, vector<1x256xf32> -> vector<4x256xf32>
    %c0_19 = arith.constant 0 : index
    %c0_20 = arith.constant 0 : index
    %52 = vector.load %arg7[%c0_19, %c0_20] : memref<4x256xf32, #tpu.memory_space<vmem>>, vector<4x256xf32>
    %53 = arith.addf %52, %51 : vector<4x256xf32>
    %c0_21 = arith.constant 0 : index
    %c0_22 = arith.constant 0 : index
    %54 = vector.load %arg7[%c0_21, %c0_22] : memref<4x256xf32, #tpu.memory_space<vmem>>, vector<4x256xf32>
    tpu.vector_store %arg7[%c0_21, %c0_22], %53 {strides = array<i32>} : memref<4x256xf32, #tpu.memory_space<vmem>>, vector<4x256xf32>,
    %c0_i32_23 = arith.constant 0 : i32
    %55 = arith.cmpi eq, %arg1, %c0_i32_23 : i32
    %56 = arith.extui %55 : i1 to i32
    %c0_i32_24 = arith.constant 0 : i32
    %57 = arith.cmpi ne, %56, %c0_i32_24 : i32
    scf.if %57 {
      %c0_25 = arith.constant 0 : index
      %c0_26 = arith.constant 0 : index
      %58 = vector.load %arg7[%c0_25, %c0_26] : memref<4x256xf32, #tpu.memory_space<vmem>>, vector<4x256xf32>
      %cst_27 = arith.constant dense<0.000000e+00> : vector<4xf32>
      %59 = vector.multi_reduction <add>, %58, %cst_27 [1] : vector<4x256xf32> to vector<4xf32>
      %60 = vector.shape_cast %59 : vector<4xf32> to vector<4x1xf32>
      %61 = vector.shape_cast %60 : vector<4x1xf32> to vector<4x1xf32>
      %62 = vector.broadcast %61 : vector<4x1xf32> to vector<4x128xf32>
      %c0_28 = arith.constant 0 : index
      %c0_29 = arith.constant 0 : index
      %c0_30 = arith.constant 0 : index
      %63 = vector.load %arg6[%c0_28, %c0_29, %c0_30] : memref<1x4x128xf32, #tpu.memory_space<vmem>>, vector<1x4x128xf32>
      %64 = vector.shape_cast %63 : vector<1x4x128xf32> to vector<4x128xf32>
      %65 = vector.shape_cast %62 : vector<4x128xf32> to vector<1x4x128xf32>
      tpu.vector_store %arg6[%c0_28, %c0_29, %c0_30], %65 {strides = array<i32>} : memref<1x4x128xf32, #tpu.memory_space<vmem>>, vector<1x4x128xf32>,
    } else {
    }
    return
  }
  func.func @transform_0(%arg0: i32, %arg1: i32) -> (i32, i32) {
    %c1_i32 = arith.constant 1 : i32
    %0 = arith.muli %arg0, %c1_i32 : i32
    %1 = arith.addi %0, %arg1 : i32
    %c0_i32 = arith.constant 0 : i32
    %c0_i32_0 = arith.constant 0 : i32
    return %c0_i32, %1 : i32, i32
  }
  func.func @transform_1(%arg0: i32, %arg1: i32) -> (i32, i32) {
    %c1_i32 = arith.constant 1 : i32
    %0 = arith.muli %arg0, %c1_i32 : i32
    %1 = arith.addi %0, %arg1 : i32
    %c0_i32 = arith.constant 0 : i32
    %c0_i32_0 = arith.constant 0 : i32
    return %c0_i32, %1 : i32, i32
  }
  func.func @transform_2(%arg0: i32, %arg1: i32) -> (i32, i32) {
    %c1_i32 = arith.constant 1 : i32
    %0 = arith.muli %arg0, %c1_i32 : i32
    %1 = arith.addi %0, %arg1 : i32
    %c0_i32 = arith.constant 0 : i32
    %c0_i32_0 = arith.constant 0 : i32
    return %c0_i32, %1 : i32, i32
  }
  func.func @transform_3(%arg0: i32, %arg1: i32) -> (i32, i32) {
    %c1_i32 = arith.constant 1 : i32
    %0 = arith.muli %arg0, %c1_i32 : i32
    %1 = arith.addi %0, %arg1 : i32
    %c0_i32 = arith.constant 0 : i32
    %c0_i32_0 = arith.constant 0 : i32
    return %c0_i32, %1 : i32, i32
  }
  func.func @transform_4(%arg0: i32, %arg1: i32) -> (i32, i32, i32) {
    %c0_i32 = arith.constant 0 : i32
    %c0_i32_0 = arith.constant 0 : i32
    %c0_i32_1 = arith.constant 0 : i32
    return %arg0, %c0_i32, %c0_i32_0 : i32, i32, i32
  }
}

</mosaic_0001>

<bundles_post_ra>
// kernel: _freq_nce_forward.1
= control target key start
LH: loop header
LB: loop body
LE: loop exit
PB: predicated region body
PF: predicated region fallthrough
CT: control target
= control target key end

     0   :  { %vm121_vm0 = vcmask 1043456   ;;  %s673_s0 = inlined_call_operand.vmem [shape: f32[4,256], index: 0, kind: input, shape index: {}]   ;;  %s674_s1 = inlined_call_operand.vmem [shape: f32[4,256], index: 1, kind: input, shape index: {}]   ;;  %s675_s2 = inlined_call_operand.vmem [shape: f32[4,256], index: 2, kind: input, shape index: {}]   ;;  %s676_s3 = inlined_call_operand.vmem [shape: f32[4,256], index: 3, kind: input, shape index: {}]   ;;  %s677_s4 = inlined_call_operand.vmem [shape: f32[1,4,128], index: 4, kind: output, shape index: {}]  }
   0x1   :  { %v492_v0 = vld [vmem:[%s673_s0] sm:$0xff] }
   0x2   :  { %v114_v1 = vmul.f32 %v492_v0, %v492_v0  ;;  %v499_v2 = vld [vmem:[%s674_s1] sm:$0xff] }
   0x3   :  { %v158_v3 = vmul.f32 %v499_v2, %v499_v2  ;;  %v508_v8 = vld [vmem:[%s675_s2] sm:$0xff] }
   0x4   :  { %116 = vst [vmem:[#allocation1] ss:$2 sm:$0xff] %v114_v1  ;;  %v201_v13 = vmul.f32 %v508_v8, %v508_v8  ;;  %v517_v22 = vld [vmem:[%s676_s3] sm:$0xff] }
   0x5   :  { %v244_v31 = vmul.f32 %v517_v22, %v517_v22  ;;  %v287_v50 = vmul.f32 %v517_v22, %v499_v2 }
   0xb   :  { %v117_v4 = vld.sshfl [vmem:[#allocation1] sm:$0xff pattern:$0x75316420]  ;;  %v118_v5 = vld.sshfl [vmem:[#allocation1 + $0x8] sm:$0xff pattern:$0x75316420] }
   0xc   :  { %v122_v6 = vsel %vm121_vm0, %v117_v4, 0.0  ;;  %v129_v7 = vsel %vm121_vm0, %v118_v5, 0.0  ;;  %160 = vst [vmem:[#allocation1] ss:$2 sm:$0xff] %v158_v3 }
   0xd   :  { %v123_v9 = vrot.slane %v122_v6, 4  ;;  %v130_v10 = vrot.slane %v129_v7, 4 }
   0xf   :  { %v124_v11 = vadd.f32 %v123_v9, %v122_v6  ;;  %v131_v12 = vadd.f32 %v130_v10, %v129_v7 }
  0x11   :  { %v125_v14 = vrot.slane %v124_v11, 2  ;;  %v132_v15 = vrot.slane %v131_v12, 2 }
  0x13   :  { %v126_v16 = vadd.f32 %v125_v14, %v124_v11  ;;  %v133_v17 = vadd.f32 %v132_v15, %v131_v12  ;;  %v161_v18 = vld.sshfl [vmem:[#allocation1] sm:$0xff pattern:$0x75316420]  ;;  %v162_v19 = vld.sshfl [vmem:[#allocation1 + $0x8] sm:$0xff pattern:$0x75316420] }
  0x14   :  { %v165_v20 = vsel %vm121_vm0, %v161_v18, 0.0  ;;  %v172_v21 = vsel %vm121_vm0, %v162_v19, 0.0  ;;  %203 = vst [vmem:[#allocation1] ss:$2 sm:$0xff] %v201_v13  ;;  %v312_v13 = vmul.f32 %v508_v8, %v492_v0 }
  0x15   :  { %v127_v23 = vrot.slane %v126_v16, 1  ;;  %v134_v24 = vrot.slane %v133_v17, 1  ;;  %v166_v25 = vrot.slane %v165_v20, 4  ;;  %v173_v26 = vrot.slane %v172_v21, 4 }
  0x17   :  { %v128_v27 = vadd.f32 %v127_v23, %v126_v16  ;;  %v135_v28 = vadd.f32 %v134_v24, %v133_v17  ;;  %v167_v29 = vadd.f32 %v166_v25, %v165_v20  ;;  %v174_v30 = vadd.f32 %v173_v26, %v172_v21 }
  0x19   :  { %v521_v32 = vmax.f32 %v128_v27, 1e-24  ;;  %v523_v33 = vmax.f32 %v135_v28, 1e-24  ;;  %v168_v34 = vrot.slane %v167_v29, 2  ;;  %v175_v35 = vrot.slane %v174_v30, 2 }
  0x1b   :  { %448 = vrsqrt.f32 %v521_v32  ;;  %v169_v36 = vadd.f32 %v168_v34, %v167_v29  ;;  %v204_v37 = vld.sshfl [vmem:[#allocation1] sm:$0xff pattern:$0x75316420]  ;;  %v205_v38 = vld.sshfl [vmem:[#allocation1 + $0x8] sm:$0xff pattern:$0x75316420]  ;;  %v176_v39 = vadd.f32 %v175_v35, %v174_v30  ;;  %vm144_vm1 = vweird.f32 %v521_v32 }
  0x1c   :  { %450 = vrsqrt.f32 %v523_v33  ;;  %v208_v40 = vsel %vm121_vm0, %v204_v37, 0.0  ;;  %v215_v41 = vsel %vm121_vm0, %v205_v38, 0.0  ;;  %246 = vst [vmem:[#allocation1] ss:$2 sm:$0xff] %v244_v31  ;;  %v337_v30 = vmul.f32 %v508_v8, %v499_v2 }
  0x1d   :  { %v170_v42 = vrot.slane %v169_v36, 1  ;;  %v209_v43 = vrot.slane %v208_v40, 4  ;;  %v216_v44 = vrot.slane %v215_v41, 4  ;;  %v177_v45 = vrot.slane %v176_v39, 1 }
  0x1e   :  { %vm154_vm2 = vweird.f32 %v523_v33  ;;  %v574_v35 = vmul.f32 %v517_v22, %v492_v0 }
  0x1f   :  { %v171_v46 = vadd.f32 %v170_v42, %v169_v36  ;;  %v210_v47 = vadd.f32 %v209_v43, %v208_v40  ;;  %v217_v48 = vadd.f32 %v216_v44, %v215_v41  ;;  %v178_v49 = vadd.f32 %v177_v45, %v176_v39 }
  0x21   :  { %v531_v51 = vpop.eup %448  ;;  %v533_v52 = vmax.f32 %v171_v46, 1e-24  ;;  %v211_v53 = vrot.slane %v210_v47, 2  ;;  %v218_v54 = vrot.slane %v217_v48, 2  ;;  %v537_v56 = vmax.f32 %v178_v49, 1e-24 }
  0x22   :  { %v535_v55 = vpop.eup %450  ;;  %v139_v59 = vmul.f32 %v531_v51, %v521_v32  ;;  %vm145_vm3 = vweird.f32 %v531_v51 }
  0x23   :  { %452 = vrsqrt.f32 %v533_v52  ;;  %v247_v57 = vld.sshfl [vmem:[#allocation1] sm:$0xff pattern:$0x75316420]  ;;  %v248_v58 = vld.sshfl [vmem:[#allocation1 + $0x8] sm:$0xff pattern:$0x75316420]  ;;  %v212_v60 = vadd.f32 %v211_v53, %v210_v47  ;;  %v149_v61 = vmul.f32 %v535_v55, %v523_v33  ;;  %v219_v62 = vadd.f32 %v218_v54, %v217_v48  ;;  %vm146_vm8 = vmor %vm144_vm1, %vm145_vm3 }
  0x24   :  { %454 = vrsqrt.f32 %v537_v56  ;;  %289 = vst [vmem:[#allocation1] ss:$2 sm:$0xff] %v287_v50  ;;  %v251_v63 = vsel %vm121_vm0, %v247_v57, 0.0  ;;  %v258_v1 = vsel %vm121_vm0, %v248_v58, 0.0  ;;  %v140_v7 = vmul.f32 %v531_v51, %v139_v59 }
  0x25   :  { %v213_v3 = vrot.slane %v212_v60, 1  ;;  %v252_v4 = vrot.slane %v251_v63, 4  ;;  %v259_v5 = vrot.slane %v258_v1, 4  ;;  %v220_v6 = vrot.slane %v219_v62, 1 }
  0x26   :  { %v150_v11 = vmul.f32 %v535_v55, %v149_v61  ;;  %v141_v23 = vmul.f32 0.5, %v140_v7  ;;  %vm155_vm4 = vweird.f32 %v535_v55  ;;  %vm187_vm5 = vweird.f32 %v533_v52 }
  0x27   :  { %v214_v9 = vadd.f32 %v213_v3, %v212_v60  ;;  %v221_v12 = vadd.f32 %v220_v6, %v219_v62  ;;  %v253_v17 = vadd.f32 %v252_v4, %v251_v63  ;;  %v260_v18 = vadd.f32 %v259_v5, %v258_v1  ;;  %vm156_vm10 = vmor %vm154_vm2, %vm155_vm4 }
  0x28   :  { %v151_v26 = vmul.f32 0.5, %v150_v11  ;;  %v142_v36 = vsub.f32 1.5, %v141_v23  ;;  %vm197_vm6 = vweird.f32 %v537_v56 }
  0x29   :  { %v548_v10 = vpop.eup %452  ;;  %v557_v16 = vmax.f32 %v214_v9, 1e-24  ;;  %v561_v20 = vmax.f32 %v221_v12, 1e-24  ;;  %v254_v28 = vrot.slane %v253_v17, 2  ;;  %v261_v29 = vrot.slane %v260_v18, 2 }
  0x2a   :  { %v553_v14 = vpop.eup %454  ;;  %v182_v15 = vmul.f32 %v548_v10, %v533_v52  ;;  %v152_v40 = vsub.f32 1.5, %v151_v26  ;;  %v143_v46 = vmul.f32 %v531_v51, %v142_v36  ;;  %vm188_vm7 = vweird.f32 %v548_v10 }
  0x2b   :  { %v192_v19 = vmul.f32 %v553_v14, %v537_v56  ;;  %v290_v21 = vld.sshfl [vmem:[#allocation1] sm:$0xff pattern:$0x75316420]  ;;  %456 = vrsqrt.f32 %v557_v16  ;;  %v291_v25 = vld.sshfl [vmem:[#allocation1 + $0x8] sm:$0xff pattern:$0x75316420]  ;;  %v255_v37 = vadd.f32 %v254_v28, %v253_v17  ;;  %v262_v38 = vadd.f32 %v261_v29, %v260_v18  ;;  %vm189_vm11 = vmor %vm187_vm5, %vm188_vm7 }
  0x2c   :  { %v183_v24 = vmul.f32 %v548_v10, %v182_v15  ;;  %458 = vrsqrt.f32 %v561_v20  ;;  %314 = vst [vmem:[#allocation1] ss:$2 sm:$0xff] %v312_v13  ;;  %v294_v34 = vsel %vm121_vm0, %v290_v21, 0.0  ;;  %v301_v39 = vsel %vm121_vm0, %v291_v25, 0.0 }
  0x2d   :  { %v193_v27 = vmul.f32 %v553_v14, %v192_v19  ;;  %v256_v41 = vrot.slane %v255_v37, 1  ;;  %v263_v42 = vrot.slane %v262_v38, 1  ;;  %v295_v43 = vrot.slane %v294_v34, 4 }
  0x2e   :  { %v184_v31 = vmul.f32 0.5, %v183_v24  ;;  %v302_v45 = vrot.slane %v301_v39, 4  ;;  %v153_v53 = vmul.f32 %v535_v55, %v152_v40  ;;  %vm198_vm9 = vweird.f32 %v553_v14 }
  0x2f   :  { %v194_v2 = vmul.f32 0.5, %v193_v27  ;;  %v257_v48 = vadd.f32 %v256_v41, %v255_v37  ;;  %v264_v58 = vadd.f32 %v263_v42, %v262_v38  ;;  %v296_v61 = vadd.f32 %v295_v43, %v294_v34  ;;  %vm199_vm13 = vmor %vm197_vm6, %vm198_vm9 }
  0x30   :  { %v185_v22 = vsub.f32 1.5, %v184_v31  ;;  %v303_v5 = vadd.f32 %v302_v45, %v301_v39  ;;  %v611_v6 = vsel %vm146_vm8, %v531_v51, %v143_v46  ;;  %vm230_vm12 = vweird.f32 %v557_v16 }
  0x31   :  { %v579_v8 = vpop.eup %456  ;;  %v195_v54 = vsub.f32 1.5, %v194_v2  ;;  %v598_v60 = vmax.f32 %v257_v48, 1e-24  ;;  %v602_v1 = vmax.f32 %v264_v58, 1e-24  ;;  %v297_v9 = vrot.slane %v296_v61, 2 }
  0x32   :  { %v582_v0 = vpop.eup %458  ;;  %v225_v44 = vmul.f32 %v579_v8, %v557_v16  ;;  %v186_v32 = vmul.f32 %v548_v10, %v185_v22  ;;  %v622_v13 = vsel %vm156_vm10, %v535_v55, %v153_v53  ;;  %vm231_vm14 = vweird.f32 %v579_v8 }
  0x33   :  { %v235_v47 = vmul.f32 %v582_v0, %v561_v20  ;;  %v315_v49 = vld.sshfl [vmem:[#allocation1] sm:$0xff pattern:$0x75316420]  ;;  %v316_v50 = vld.sshfl [vmem:[#allocation1 + $0x8] sm:$0xff pattern:$0x75316420]  ;;  %460 = vrsqrt.f32 %v598_v60  ;;  %v196_v33 = vmul.f32 %v553_v14, %v195_v54  ;;  %vm240_vm15 = vweird.f32 %v561_v20  ;;  %vm232_vm2 = vmor %vm230_vm12, %vm231_vm14 }
  0x34   :  { %v226_v57 = vmul.f32 %v579_v8, %v225_v44  ;;  %339 = vst [vmem:[#allocation1] ss:$2 sm:$0xff] %v337_v30  ;;  %v319_v62 = vsel %vm121_vm0, %v315_v49, 0.0  ;;  %462 = vrsqrt.f32 %v602_v1  ;;  %v326_v12 = vsel %vm121_vm0, %v316_v50, 0.0 }
  0x35   :  { %v236_v59 = vmul.f32 %v582_v0, %v235_v47  ;;  %v320_v3 = vrot.slane %v319_v62, 4  ;;  %v327_v52 = vrot.slane %v326_v12, 4  ;;  %v630_v15 = vsel %vm189_vm11, %v548_v10, %v186_v32 }
  0x36   :  { %v227_v63 = vmul.f32 0.5, %v226_v57  ;;  %v304_v17 = vrot.slane %v303_v5, 2  ;;  %vm241_vm1 = vweird.f32 %v582_v0  ;;  %v200_v25 = vsel %vm199_vm13, %v553_v14, %v196_v33 }
  0x37   :  { %v237_v4 = vmul.f32 0.5, %v236_v59  ;;  %v321_v11 = vadd.f32 %v320_v3, %v319_v62  ;;  %v328_v21 = vadd.f32 %v327_v52, %v326_v12  ;;  %v298_v10 = vadd.f32 %v297_v9, %v296_v61  ;;  %vm242_vm4 = vmor %vm240_vm15, %vm241_vm1 }
  0x38   :  { %v228_v7 = vsub.f32 1.5, %v227_v63  ;;  %vm273_vm3 = vweird.f32 %v598_v60  ;;  %vm283_vm5 = vweird.f32 %v602_v1  ;;  %v305_v16 = vadd.f32 %v304_v17, %v303_v5 }
  0x39   :  { %v238_v51 = vsub.f32 1.5, %v237_v4  ;;  %v322_v18 = vrot.slane %v321_v11, 2  ;;  %v461_v24 = vpop.eup %460  ;;  %v329_v31 = vrot.slane %v328_v21, 2  ;;  %v299_v47 = vrot.slane %v298_v10, 1 }
  0x3a   :  { %v229_v55 = vmul.f32 %v579_v8, %v228_v7  ;;  %v463_v28 = vpop.eup %462  ;;  %v268_v30 = vmul.f32 %v461_v24, %v598_v60  ;;  %vm274_vm6 = vweird.f32 %v461_v24  ;;  %vm387_vm10 = vcmask 1040384  }
  0x3b   :  { %v340_v19 = vld.sshfl [vmem:[#allocation1] sm:$0xff pattern:$0x75316420]  ;;  %v341_v23 = vld.sshfl [vmem:[#allocation1 + $0x8] sm:$0xff pattern:$0x75316420]  ;;  %v323_v26 = vadd.f32 %v322_v18, %v321_v11  ;;  %v239_v29 = vmul.f32 %v582_v0, %v238_v51  ;;  %v278_v14 = vmul.f32 %v463_v28, %v602_v1  ;;  %v330_v37 = vadd.f32 %v329_v31, %v328_v21  ;;  %vm275_vm8 = vmor %vm273_vm3, %vm274_vm6 }
  0x3c   :  { %v344_v56 = vsel %vm121_vm0, %v340_v19, 0.0  ;;  %364 = vst [vmem:[#allocation1] ss:$2 sm:$0xff] %v574_v35  ;;  %v233_v35 = vsel %vm232_vm2, %v579_v8, %v229_v55  ;;  %v269_v36 = vmul.f32 %v461_v24, %v268_v30  ;;  %v351_v38 = vsel %vm121_vm0, %v341_v23, 0.0 }
  0x3d   :  { %v345_v27 = vrot.slane %v344_v56, 4  ;;  %v279_v39 = vmul.f32 %v463_v28, %v278_v14  ;;  %v324_v40 = vrot.slane %v323_v26, 1  ;;  %v352_v41 = vrot.slane %v351_v38, 4 }
  0x3e   :  { %v243_v42 = vsel %vm242_vm4, %v582_v0, %v239_v29  ;;  %v270_v20 = vmul.f32 0.5, %v269_v36  ;;  %v331_v43 = vrot.slane %v330_v37, 1  ;;  %vm284_vm7 = vweird.f32 %v463_v28 }
  0x3f   :  { %v346_v34 = vadd.f32 %v345_v27, %v344_v56  ;;  %v280_v22 = vmul.f32 0.5, %v279_v39  ;;  %v353_v45 = vadd.f32 %v352_v41, %v351_v38  ;;  %v306_v8 = vrot.slane %v305_v16, 1  ;;  %vm285_vm9 = vmor %vm283_vm5, %vm284_vm7 }
  0x40   :  { %v271_v46 = vsub.f32 1.5, %v270_v20  ;;  %v333_v48 = vmul.f32 %v233_v35, %v611_v6  ;;  %v325_v53 = vadd.f32 %v324_v40, %v323_v26  ;;  %v334_v0 = vmul.f32 %v243_v42, %v622_v13 }
  0x41   :  { %v347_v2 = vrot.slane %v346_v34, 2  ;;  %v281_v50 = vsub.f32 1.5, %v280_v22  ;;  %v354_v54 = vrot.slane %v353_v45, 2  ;;  %v332_v59 = vadd.f32 %v331_v43, %v330_v37 }
  0x42   :  { %v272_v58 = vmul.f32 %v461_v24, %v271_v46  ;;  %v300_v5 = vadd.f32 %v299_v47, %v298_v10  ;;  %v307_v7 = vadd.f32 %v306_v8, %v305_v16  ;;  %v358_v1 = vmul.f32 %v233_v35, %v630_v15 }
  0x43   :  { %v348_v44 = vadd.f32 %v347_v2, %v346_v34  ;;  %v365_v49 = vld.sshfl [vmem:[#allocation1] sm:$0xff pattern:$0x75316420]  ;;  %v366_v57 = vld.sshfl [vmem:[#allocation1 + $0x8] sm:$0xff pattern:$0x75316420]  ;;  %v282_v63 = vmul.f32 %v463_v28, %v281_v50  ;;  %v355_v60 = vadd.f32 %v354_v54, %v353_v45  ;;  %v359_v52 = vmul.f32 %v243_v42, %v200_v25 }
  0x44   :  { %v369_v61 = vsel %vm121_vm0, %v365_v49, 0.0  ;;  %v376_v62 = vsel %vm121_vm0, %v366_v57, 0.0  ;;  %v276_v4 = vsel %vm275_vm8, %v461_v24, %v272_v58  ;;  %v335_v19 = vmul.f32 %v333_v48, %v325_v53 }
  0x45   :  { %v349_v3 = vrot.slane %v348_v44, 1  ;;  %v370_v32 = vrot.slane %v369_v61, 4  ;;  %v377_v33 = vrot.slane %v376_v62, 4  ;;  %v286_v9 = vsel %vm285_vm9, %v463_v28, %v282_v63 }
  0x46   :  { %v308_v11 = vmul.f32 %v276_v4, %v630_v15  ;;  %v356_v12 = vrot.slane %v355_v60, 1  ;;  %v309_v51 = vmul.f32 %v286_v9, %v200_v25  ;;  %v336_v55 = vmul.f32 %v334_v0, %v332_v59 }
  0x47   :  { %v371_v17 = vadd.f32 %v370_v32, %v369_v61  ;;  %v378_v18 = vadd.f32 %v377_v33, %v376_v62  ;;  %v350_v21 = vadd.f32 %v349_v3, %v348_v44  ;;  %vm390_vm11 = vcmask 1041408  }
  0x48   :  { %v357_v23 = vadd.f32 %v356_v12, %v355_v60  ;;  %v310_v56 = vmul.f32 %v308_v11, %v300_v5  ;;  %v311_v26 = vmul.f32 %v309_v51, %v307_v7  ;;  %v383_v15 = vmul.f32 %v276_v4, %v611_v6 }
  0x49   :  { %v372_v24 = vrot.slane %v371_v17, 2  ;;  %v379_v10 = vrot.slane %v378_v18, 2  ;;  %v360_v29 = vmul.f32 %v358_v1, %v350_v21  ;;  %v384_v25 = vmul.f32 %v286_v9, %v622_v13 }
  0x4a   :  { %v361_v30 = vmul.f32 %v359_v52, %v357_v23  ;;  %v388_v16 = vsel %vm387_vm10, %v310_v56, %v335_v19  ;;  %v389_v34 = vsel %vm387_vm10, %v311_v26, %v336_v55  ;;  %vm393_vm12 = vcmask 1042432  }
  0x4b   :  { %v373_v27 = vadd.f32 %v372_v24, %v371_v17  ;;  %v380_v28 = vadd.f32 %v379_v10, %v378_v18  ;;  %v391_v37 = vsel %vm390_vm11, %v388_v16, %v360_v29 }
  0x4c   :  { %v392_v38 = vsel %vm390_vm11, %v389_v34, %v361_v30 }
  0x4d   :  { %v374_v31 = vrot.slane %v373_v27, 1  ;;  %v381_v14 = vrot.slane %v380_v28, 1 }
  0x4f   :  { %v375_v35 = vadd.f32 %v374_v31, %v373_v27  ;;  %v382_v36 = vadd.f32 %v381_v14, %v380_v28 }
  0x51   :  { %v385_v39 = vmul.f32 %v383_v15, %v375_v35  ;;  %v386_v40 = vmul.f32 %v384_v25, %v382_v36 }
  0x53   :  { %v394_v2 = vsel %vm393_vm12, %v391_v37, %v385_v39  ;;  %v395_v41 = vsel %vm393_vm12, %v392_v38, %v386_v40 }
  0x54   :  { %v399_v42 = vrot.slane %v395_v41, 4 }
  0x56   :  { %v400_v20 = vsel %vm121_vm0, %v394_v2, %v399_v42 }
  0x57   :  { %409 = vst [vmem:[#allocation1] ss:$2 sm:$0xff] %v400_v20 }
  0x5e   :  { %v410_v6 = vld.sshfl [vmem:[#allocation1] sm:$0xff pattern:$0x75316420]  ;;  %v411_v43 = vld.sshfl [vmem:[#allocation1 + $0x8] sm:$0xff pattern:$0x75316420] }
  0x5f   :  { %v414_v13 = vsel %vm121_vm0, %v410_v6, 0.0  ;;  %v415_v22 = vsel %vm121_vm0, %v411_v43, 0.0 }
  0x60   :  { %v416_v44 = vadd.f32 %v415_v22, %v414_v13 }
  0x62   :  { %417 = vadd.xlane.f32.xlu0 %v416_v44 }
  0xd5   :  { %v418_v45 = vpop.xlane.xlu0 %417 }
  0xd6   :  { %419 = vst [vmem:[%s677_s4] sm:$0xf] %v418_v45 }

</bundles_post_ra>
